<compile_context>
chip_gen: v6e
topology: v6e:2x2x1
jax: 0.10.0
libtpu: 0.0.40
codegen_flags: <defaults>
</compile_context>

<pallas_src>
import functools

import jax
import jax.numpy as jnp
from jax.experimental import pallas as pl
from jax.experimental.pallas import tpu as pltpu

HIDDEN = 768          # wav2vec2-base config.hidden_size
MLP_DIM = 256
NUM_CLASSES = 2
LANE = 128


def classifier_head_kernel(h_ref, w1_ref, b1_ref, w2_ref, b2_ref, o_ref, acc_ref,
                           *, seq_len, block_t, needs_mask):
    t = pl.program_id(1)
    n_t = pl.num_programs(1)

    @pl.when(t == 0)
    def _init():
        acc_ref[...] = jnp.zeros_like(acc_ref)

    def _accumulate(mask_tail):
        h = h_ref[...].astype(jnp.float32)
        if mask_tail:
            # Zero the rows of the (partial) last tile that lie past T so the
            # unspecified padded DMA region never leaks into the mean.
            row = jax.lax.broadcasted_iota(jnp.int32, h.shape, dimension=1)
            h = jnp.where(t * block_t + row < seq_len, h, 0.0)
        acc_ref[...] += jnp.sum(h, axis=1)

    if needs_mask:
        # Keep iota+cmp+select off the steady-state VPU path; only the final
        # (partial) tile pays for the mask.
        pl.when(t < n_t - 1)(lambda: _accumulate(False))
        pl.when(t == n_t - 1)(lambda: _accumulate(True))
    else:
        _accumulate(False)

    @pl.when(t == n_t - 1)
    def _epilogue():
        # mean @ W1 + b1  ==  (sum * (1/T)) @ W1 + b1   (1/T folded here)
        mean = acc_ref[...] * jnp.float32(1.0 / seq_len)
        z = jnp.dot(mean.astype(w1_ref.dtype), w1_ref[...],
                    preferred_element_type=jnp.float32) + b1_ref[...]
        z = jnp.maximum(z, 0.0)
        # TODO(synk): Dropout(0.2) is inference-mode identity (no RNG mask / VJP);
        #             do not reuse this kernel for the training forward pass.
        o_ref[...] = jnp.dot(z.astype(w2_ref.dtype), w2_ref[...],
                             preferred_element_type=jnp.float32) + b2_ref[...]


def _vmem_capacity_bytes():
    try:
        return int(pltpu.get_tpu_info().vmem_capacity_bytes)
    except Exception:
        return 64 * 1024 * 1024   # conservative fallback (v7x per-TC VMEM)


def _pick_block_t(batch_block, seq_len, hidden, itemsize):
    """Largest layout-friendly T tile whose double-buffered input fits a
    generation-aware VMEM budget."""
    # Sublane packing: f32 -> 8 rows, bf16 -> 16, 1-byte dtypes -> 32.
    mult = 8 * max(1, 4 // itemsize)
    if seq_len <= mult:
        return seq_len
    budget = min(int(_vmem_capacity_bytes() * 0.35), 40 * 1024 * 1024)
    max_t = max(1, budget // (2 * batch_block * hidden * itemsize))
    t = min(seq_len, max_t, 2048)
    return max(mult, (t // mult) * mult)


def wav2vec_classifier_head(hidden, w1, b1, w2, b2, *, block_t=None,
                            weights_dtype=jnp.bfloat16):
    """hidden: [B, T, H]; returns logits [B, num_classes] f32."""
    B, T, H = hidden.shape
    C = w2.shape[1]
    assert w1.shape == (H, MLP_DIM)

    # Lane-dense padded output: pad the classifier columns up to 128.
    C_pad = ((C + LANE - 1) // LANE) * LANE

    # Resident weights in bf16 (native bf16 MXU, f32 accumulate); biases f32.
    w1k = w1.astype(weights_dtype)
    b1k = b1.astype(jnp.float32).reshape(1, MLP_DIM)
    w2k = jnp.zeros((MLP_DIM, C_pad), weights_dtype).at[:, :C].set(
        w2.astype(weights_dtype))
    b2k = jnp.zeros((1, C_pad), jnp.float32).at[:, :C].set(
        b2.astype(jnp.float32).reshape(1, C))

    # Stream `hidden` in its native dtype (no wrapper-side cast -> no extra
    # HBM round-trip); the kernel upcasts to f32 only for accumulation.
    itemsize = jnp.dtype(hidden.dtype).itemsize

    # Batch tiling: keep the whole batch in one block for small B; split in
    # chunks of 8 for large B so the leading "parallel" axis can be sharded
    # across TensorCores (v7x megacore).
    bB = 8 if (B > 8 and B % 8 == 0) else B

    if block_t is None:
        block_t = _pick_block_t(bB, T, H, itemsize)
    num_t = pl.cdiv(T, block_t)
    num_b = pl.cdiv(B, bB)
    needs_mask = (T % block_t) != 0

    # Explicit VMEM limit: double-buffered hidden tile + (double-buffered)
    # weights/biases/output + accumulator + margin.
    tile_bytes = bB * block_t * H * itemsize
    w_bytes = 2 * ((H * MLP_DIM + MLP_DIM * C_pad) * jnp.dtype(weights_dtype).itemsize
                   + (MLP_DIM + C_pad) * 4)
    io_bytes = 2 * bB * C_pad * 4 + bB * H * 4
    vmem_limit = max(2 * tile_bytes + w_bytes + io_bytes + (4 << 20), 16 << 20)

    kernel = functools.partial(classifier_head_kernel, seq_len=T,
                               block_t=block_t, needs_mask=needs_mask)

    out_pad = pl.pallas_call(
        kernel,
        out_shape=jax.ShapeDtypeStruct((B, C_pad), jnp.float32),
        grid=(num_b, num_t),
        in_specs=[
            # hidden: streamed in (bB, block_t, H) tiles, double-buffered.
            pl.BlockSpec((bB, block_t, H), lambda b, t: (b, t, 0)),
            # weights/biases: constant block index -> DMA'd once, VMEM-resident.
            pl.BlockSpec((H, MLP_DIM), lambda b, t: (0, 0)),
            pl.BlockSpec((1, MLP_DIM), lambda b, t: (0, 0)),
            pl.BlockSpec((MLP_DIM, C_pad), lambda b, t: (0, 0)),
            pl.BlockSpec((1, C_pad), lambda b, t: (0, 0)),
        ],
        out_specs=pl.BlockSpec((bB, C_pad), lambda b, t: (b, 0)),
        scratch_shapes=[pltpu.VMEM((bB, H), jnp.float32)],
        compiler_params=pltpu.CompilerParams(
            # batch axis parallel (megacore), T is the carried reduction.
            dimension_semantics=("parallel", "arbitrary"),
            vmem_limit_bytes=int(vmem_limit)),
    )(hidden, w1k, b1k, w2k, b2k)

    return out_pad[:, :C]


def reference(hidden, w1, b1, w2, b2):
    pooled = hidden.mean(axis=1)
    z = jnp.maximum(pooled @ w1 + b1, 0.0)
    return z @ w2 + b2


if __name__ == "__main__":
    key = jax.random.PRNGKey(0)
    k_h, k_w1, k_b1, k_w2, k_b2 = jax.random.split(key, 5)

    B, T = 2, 20  # small batch / sequence of wav2vec2 frames (partial last tile)
    # Stand-in for wav2vec2(x).last_hidden_state (frozen backbone output).
    hidden = jax.random.normal(k_h, (B, T, HIDDEN), dtype=jnp.float32)

    # Deterministic classifier parameters (shapes from the module's __init__).
    w1 = jax.random.normal(k_w1, (HIDDEN, MLP_DIM), dtype=jnp.float32) * 0.02
    b1 = jax.random.normal(k_b1, (1, MLP_DIM), dtype=jnp.float32) * 0.02
    w2 = jax.random.normal(k_w2, (MLP_DIM, NUM_CLASSES), dtype=jnp.float32) * 0.02
    b2 = jax.random.normal(k_b2, (1, NUM_CLASSES), dtype=jnp.float32) * 0.02

    # block_t=8 exercises multi-step accumulation + the masked partial last tile
    # (2 steady-state tiles + 1 tail tile of 4 valid rows).
    out = wav2vec_classifier_head(hidden, w1, b1, w2, b2, block_t=8)
    out = jax.block_until_ready(out)

    # Validate against the true fp32 reference (tolerance covers the bf16
    # weights / bf16-MXU epilogue; the pooled sum itself is exact f32).
    ref = reference(hidden, w1, b1, w2, b2)
    assert out.shape == (B, NUM_CLASSES)
    max_err = float(jnp.max(jnp.abs(out - ref)))
    assert jnp.allclose(out, ref, atol=5e-3, rtol=5e-2), \
        f"mismatch vs fp32 reference (max abs err {max_err})"

    print("KERNEL_OK")
</pallas_src>

<mosaic_0001>
module attributes {stable_mosaic.version = 11 : i64} {
  func.func @classifier_head_kernel(%arg0: i32, %arg1: i32, %arg2: memref<2x8x768xf32, #tpu.memory_space<vmem>>, %arg3: memref<768x256xbf16, #tpu.memory_space<vmem>>, %arg4: memref<1x256xf32, #tpu.memory_space<vmem>>, %arg5: memref<256x128xbf16, #tpu.memory_space<vmem>>, %arg6: memref<1x128xf32, #tpu.memory_space<vmem>>, %arg7: memref<2x128xf32, #tpu.memory_space<vmem>>, %arg8: memref<2x768xf32, #tpu.memory_space<vmem>>) attributes {dimension_semantics = [#tpu.dimension_semantics<parallel>, #tpu.dimension_semantics<arbitrary>], iteration_bounds = array<i64: 1, 3>, scalar_prefetch = 0 : i64, scratch_operands = 1 : i64, tpu.core_type = #tpu.core_type<tc>, window_params = [{transform_indices = @transform_0, window_bounds = array<i64: 2, 8, 768>}, {pipeline_mode = #tpu.pipeline_mode<synchronous>, transform_indices = @transform_1, window_bounds = array<i64: 768, 256>}, {pipeline_mode = #tpu.pipeline_mode<synchronous>, transform_indices = @transform_2, window_bounds = array<i64: 1, 256>}, {pipeline_mode = #tpu.pipeline_mode<synchronous>, transform_indices = @transform_3, window_bounds = array<i64: 256, 128>}, {pipeline_mode = #tpu.pipeline_mode<synchronous>, transform_indices = @transform_4, window_bounds = array<i64: 1, 128>}, {transform_indices = @transform_5, window_bounds = array<i64: 2, 128>}]} {
    %c0_i32 = arith.constant 0 : i32
    %0 = arith.cmpi eq, %arg1, %c0_i32 : i32
    %1 = arith.extui %0 : i1 to i32
    %c0_i32_0 = arith.constant 0 : i32
    %2 = arith.cmpi ne, %1, %c0_i32_0 : i32
    scf.if %2 {
      %cst = arith.constant 0.000000e+00 : f32
      %12 = vector.broadcast %cst : f32 to vector<2x768xf32>
      %c0 = arith.constant 0 : index
      %c0_6 = arith.constant 0 : index
      %13 = vector.load %arg8[%c0, %c0_6] : memref<2x768xf32, #tpu.memory_space<vmem>>, vector<2x768xf32>
      tpu.vector_store %arg8[%c0, %c0_6], %12 {strides = array<i32>} : memref<2x768xf32, #tpu.memory_space<vmem>>, vector<2x768xf32>,
    } else {
    }
    %c2_i32 = arith.constant 2 : i32
    %3 = arith.cmpi slt, %arg1, %c2_i32 : i32
    %4 = arith.extui %3 : i1 to i32
    %c0_i32_1 = arith.constant 0 : i32
    %5 = arith.cmpi ne, %4, %c0_i32_1 : i32
    scf.if %5 {
      %c0 = arith.constant 0 : index
      %c0_6 = arith.constant 0 : index
      %c0_7 = arith.constant 0 : index
      %12 = vector.load %arg2[%c0, %c0_6, %c0_7] : memref<2x8x768xf32, #tpu.memory_space<vmem>>, vector<2x8x768xf32>
      %c0_8 = arith.constant 0 : index
      %c0_9 = arith.constant 0 : index
      %13 = vector.load %arg8[%c0_8, %c0_9] : memref<2x768xf32, #tpu.memory_space<vmem>>, vector<2x768xf32>
      %cst = arith.constant dense<0.000000e+00> : vector<2x768xf32>
      %14 = vector.multi_reduction <add>, %12, %cst [1] : vector<2x8x768xf32> to vector<2x768xf32>
      %15 = arith.addf %13, %14 : vector<2x768xf32>
      %c0_10 = arith.constant 0 : index
      %c0_11 = arith.constant 0 : index
      %16 = vector.load %arg8[%c0_10, %c0_11] : memref<2x768xf32, #tpu.memory_space<vmem>>, vector<2x768xf32>
      tpu.vector_store %arg8[%c0_10, %c0_11], %15 {strides = array<i32>} : memref<2x768xf32, #tpu.memory_space<vmem>>, vector<2x768xf32>,
    } else {
    }
    %c2_i32_2 = arith.constant 2 : i32
    %6 = arith.cmpi eq, %arg1, %c2_i32_2 : i32
    %7 = arith.extui %6 : i1 to i32
    %c0_i32_3 = arith.constant 0 : i32
    %8 = arith.cmpi ne, %7, %c0_i32_3 : i32
    scf.if %8 {
      %c0 = arith.constant 0 : index
      %c0_6 = arith.constant 0 : index
      %c0_7 = arith.constant 0 : index
      %12 = vector.load %arg2[%c0, %c0_6, %c0_7] : memref<2x8x768xf32, #tpu.memory_space<vmem>>, vector<2x8x768xf32>
      %13 = tpu.iota {dimensions = array<i32: 1>} : vector<2x8x768xi32>
      %c8_i32 = arith.constant 8 : i32
      %14 = arith.muli %arg1, %c8_i32 : i32
      %15 = vector.broadcast %14 : i32 to vector<2x8x768xi32>
      %16 = arith.addi %15, %13 : vector<2x8x768xi32>
      %c20_i32 = arith.constant 20 : i32
      %17 = vector.broadcast %c20_i32 : i32 to vector<2x8x768xi32>
      %18 = arith.cmpi slt, %16, %17 : vector<2x8x768xi32>
      %cst = arith.constant 0.000000e+00 : f32
      %19 = vector.broadcast %cst : f32 to vector<2x8x768xf32>
      %20 = arith.select %18, %12, %19 : vector<2x8x768xi1>, vector<2x8x768xf32>
      %c0_8 = arith.constant 0 : index
      %c0_9 = arith.constant 0 : index
      %21 = vector.load %arg8[%c0_8, %c0_9] : memref<2x768xf32, #tpu.memory_space<vmem>>, vector<2x768xf32>
      %cst_10 = arith.constant dense<0.000000e+00> : vector<2x768xf32>
      %22 = vector.multi_reduction <add>, %20, %cst_10 [1] : vector<2x8x768xf32> to vector<2x768xf32>
      %23 = arith.addf %21, %22 : vector<2x768xf32>
      %c0_11 = arith.constant 0 : index
      %c0_12 = arith.constant 0 : index
      %24 = vector.load %arg8[%c0_11, %c0_12] : memref<2x768xf32, #tpu.memory_space<vmem>>, vector<2x768xf32>
      tpu.vector_store %arg8[%c0_11, %c0_12], %23 {strides = array<i32>} : memref<2x768xf32, #tpu.memory_space<vmem>>, vector<2x768xf32>,
    } else {
    }
    %c2_i32_4 = arith.constant 2 : i32
    %9 = arith.cmpi eq, %arg1, %c2_i32_4 : i32
    %10 = arith.extui %9 : i1 to i32
    %c0_i32_5 = arith.constant 0 : i32
    %11 = arith.cmpi ne, %10, %c0_i32_5 : i32
    scf.if %11 {
      %c0 = arith.constant 0 : index
      %c0_6 = arith.constant 0 : index
      %12 = vector.load %arg8[%c0, %c0_6] : memref<2x768xf32, #tpu.memory_space<vmem>>, vector<2x768xf32>
      %cst = arith.constant 5.000000e-02 : f32
      %13 = vector.broadcast %cst : f32 to vector<2x768xf32>
      %14 = arith.mulf %12, %13 : vector<2x768xf32>
      %15 = arith.truncf %14 : vector<2x768xf32> to vector<2x768xbf16>
      %c0_7 = arith.constant 0 : index
      %c0_8 = arith.constant 0 : index
      %16 = vector.load %arg3[%c0_7, %c0_8] : memref<768x256xbf16, #tpu.memory_space<vmem>>, vector<768x256xbf16>
      %cst_9 = arith.constant dense<0.000000e+00> : vector<2x256xf32>
      %17 = tpu.matmul %15, %16, %cst_9 {dimension_numbers = #tpu.dot_dimension_numbers<[1], [0], [0], [1], [0, 0, 1, 1], [], []>} : vector<2x768xbf16>, vector<768x256xbf16>, vector<2x256xf32> -> vector<2x256xf32>
      %c0_10 = arith.constant 0 : index
      %c0_11 = arith.constant 0 : index
      %18 = vector.load %arg4[%c0_10, %c0_11] : memref<1x256xf32, #tpu.memory_space<vmem>>, vector<1x256xf32>
      %19 = vector.broadcast %18 : vector<1x256xf32> to vector<2x256xf32>
      %20 = arith.addf %17, %19 : vector<2x256xf32>
      %cst_12 = arith.constant 0.000000e+00 : f32
      %21 = vector.broadcast %cst_12 : f32 to vector<2x256xf32>
      %22 = arith.maximumf %20, %21 : vector<2x256xf32>
      %23 = arith.truncf %22 : vector<2x256xf32> to vector<2x256xbf16>
      %c0_13 = arith.constant 0 : index
      %c0_14 = arith.constant 0 : index
      %24 = vector.load %arg5[%c0_13, %c0_14] : memref<256x128xbf16, #tpu.memory_space<vmem>>, vector<256x128xbf16>
      %cst_15 = arith.constant dense<0.000000e+00> : vector<2x128xf32>
      %25 = tpu.matmul %23, %24, %cst_15 {dimension_numbers = #tpu.dot_dimension_numbers<[1], [0], [0], [1], [0, 0, 1, 1], [], []>} : vector<2x256xbf16>, vector<256x128xbf16>, vector<2x128xf32> -> vector<2x128xf32>
      %c0_16 = arith.constant 0 : index
      %c0_17 = arith.constant 0 : index
      %26 = vector.load %arg6[%c0_16, %c0_17] : memref<1x128xf32, #tpu.memory_space<vmem>>, vector<1x128xf32>
      %27 = vector.broadcast %26 : vector<1x128xf32> to vector<2x128xf32>
      %28 = arith.addf %25, %27 : vector<2x128xf32>
      %c0_18 = arith.constant 0 : index
      %c0_19 = arith.constant 0 : index
      %29 = vector.load %arg7[%c0_18, %c0_19] : memref<2x128xf32, #tpu.memory_space<vmem>>, vector<2x128xf32>
      tpu.vector_store %arg7[%c0_18, %c0_19], %28 {strides = array<i32>} : memref<2x128xf32, #tpu.memory_space<vmem>>, vector<2x128xf32>,
    } else {
    }
    return
  }
  func.func @transform_0(%arg0: i32, %arg1: i32) -> (i32, i32, i32) {
    %c0_i32 = arith.constant 0 : i32
    %c0_i32_0 = arith.constant 0 : i32
    return %arg0, %arg1, %c0_i32 : i32, i32, i32
  }
  func.func @transform_1(%arg0: i32, %arg1: i32) -> (i32, i32) {
    %c0_i32 = arith.constant 0 : i32
    %c0_i32_0 = arith.constant 0 : i32
    %c0_i32_1 = arith.constant 0 : i32
    return %c0_i32, %c0_i32_0 : i32, i32
  }
  func.func @transform_2(%arg0: i32, %arg1: i32) -> (i32, i32) {
    %c0_i32 = arith.constant 0 : i32
    %c0_i32_0 = arith.constant 0 : i32
    %c0_i32_1 = arith.constant 0 : i32
    return %c0_i32, %c0_i32_0 : i32, i32
  }
  func.func @transform_3(%arg0: i32, %arg1: i32) -> (i32, i32) {
    %c0_i32 = arith.constant 0 : i32
    %c0_i32_0 = arith.constant 0 : i32
    %c0_i32_1 = arith.constant 0 : i32
    return %c0_i32, %c0_i32_0 : i32, i32
  }
  func.func @transform_4(%arg0: i32, %arg1: i32) -> (i32, i32) {
    %c0_i32 = arith.constant 0 : i32
    %c0_i32_0 = arith.constant 0 : i32
    %c0_i32_1 = arith.constant 0 : i32
    return %c0_i32, %c0_i32_0 : i32, i32
  }
  func.func @transform_5(%arg0: i32, %arg1: i32) -> (i32, i32) {
    %c0_i32 = arith.constant 0 : i32
    %c0_i32_0 = arith.constant 0 : i32
    return %arg0, %c0_i32 : i32, i32
  }
}

</mosaic_0001>

<bundles_post_ra>
// kernel: tpu_custom_call.1
= control target key start
LH: loop header
LB: loop body
LE: loop exit
PB: predicated region body
PF: predicated region fallthrough
CT: control target
= control target key end

     0   :  { %10 = vsyncpa [#allocation5], 0  ;;  %s2454_s0 = inlined_call_operand.vmem [shape: f32[2,20,768], index: 0, kind: input, shape index: {}]   ;;  %s2455_s1 = inlined_call_operand.hbm [shape: bf16[768,256], index: 1, kind: input, shape index: {}]   ;;  %s2456_s2 = inlined_call_operand.vmem [shape: f32[1,256], index: 2, kind: input, shape index: {}]   ;;  %s2457_s3 = inlined_call_operand.vmem [shape: bf16[256,128], index: 3, kind: input, shape index: {}]   ;;  %s2458_s4 = inlined_call_operand.vmem [shape: f32[1,128], index: 4, kind: input, shape index: {}]   ;;  %s2459_s5 = inlined_call_operand.hbm [shape: f32[2,128], index: 5, kind: output, shape index: {}]  }
   0x1   :  { %11 = vsyncpa [#allocation6], 0  ;;  %s2197_s18 = smov 0   ;;  %s2199_s19 = smov 0  }
   0x2   :  { %s2201_s20 = smov 0   ;;  %s2203_s21 = smov 0  }
   0x3   :  { %s2205_s22 = smov 0  }
   0x4 LB: > { %s1686_s23 = sadd.s32 4294967295, %s2158_s22   ;;  %s26_s24 = sadd.s32 1, %s2154_s21  ;;  %s2158_s22 = sphi %s2205_s22, %s17_s22   ;;  %s2154_s21 = sphi %s2203_s21, %s2467_s21   ;;  %s2150_s20 = sphi %s2201_s20, %s2466_s20   ;;  %s2146_s19 = sphi %s2199_s19, %s2465_s19   ;;  %s2142_s18 = sphi %s2197_s18, %s2464_s18  }
   0x5   : > { %p27_p0 = scmp.ge.s32.totalorder %s26_s24, 3  ;;  %s38_s25 = sadd.s32 1, %s2146_s19 }
   0x6   : > { %p45_p1 = scmp.ne.s32.totalorder %s2146_s19, %s2142_s18  ;;  %p46_p2 = scmp.eq.s32.totalorder %s2158_s22, 0 }
   0x7   : > { %s2469_s24 = smov (%p27_p0, %s26_s24), 0  ;;  %p1687_p4 = scmp.ge.s32.totalorder %s2158_s22, 1 }
   0x8   : > { %p2230_p3 = por %p46_p2, %p45_p1  ;;  %s34_s27 = ssub.s32 %s2154_s21, %s2469_s24 }
   0x9   : > { %p172_p5 = scmp.lt.s32.totalorder %s2158_s22, 4  ;;  %p36_p6 = scmp.eq.s32.totalorder %s34_s27, 0 }
   0xa   : > { %p2244_p8 = scmp.eq.s32.totalorder %s1686_s23, 0  ;;  %s2160_s6 = smov [#allocation4]  }
   0xb   : > { %p2238_p7 = pnand %p1687_p4, %p172_p5  ;;  %s184_s7 = sshll.u32 %s2160_s6, 4  ;;  %s185_s7 = int_to_ptr.vmem [resolvable:$true] %s184_s7 }
   0xc   : > { %s2249_s30 = scalar_select %p36_p6, %s2146_s19, %s38_s25  }
   0xd   : > { %p1847_p9 = pneg %p2238_p7  ;;  %s2073_s8 = scalar_lea.vmem %s185_s7, 12288 }
   0xe   : > { %p2074_p12 = scmp.ne.s32.totalorder %s185_s7, %s2073_s8  ;;  %p2081_p1 = scmp.lt.s32.totalorder %s185_s7, %s185_s7 }
   0xf   : > { %p1848_p10 = pnand %p2244_p8, %p1847_p9  ;;  %p2082_p2 = scmp.lt.s32.totalorder %s2073_s8, %s2073_s8 }
  0x11   : > { %p2064_p11 = pneg %p1848_p10  ;;  %p2083_p4 = por %p2082_p2, %p2081_p1 }
  0x13   : > { %p2076_p13 = pnand %p2074_p12, %p2064_p11 }
  0x15   : > { %p2077_p0 = pneg %p2076_p13 }
  0x17   : > { %p2084_p5 = pnand %p2083_p4, %p2077_p0 }
  0x19   : > { %2087 = shalt.err (!%p2084_p5)
}
  0x1a   : > { %s2161_s9 = smov 128   ;;  %s2162_s10 = smov 8  }
  0x1b   : > { %1850 = dma.hbm_to_vmem [thread:$0]  (!%p1848_p10), %s2455_s1, 12288, %s185_s7, [#allocation5], %s2161_s9, %s2161_s9, %s2162_s10  }
  0x1c   : > { %p1689_p6 = scmp.ge.s32.totalorder %s2158_s22, 3 }
  0x1e   : > { %203 = sbr.rel (%p1689_p6) target bundleno = 46 (0x2e), region = 32 }
  0x23   : > { %206 = sbr.rel (!%p2230_p3) target bundleno = 46 (0x2e), region = 36  ;;  %s208_s13 = sand.u32 (%p2230_p3), 1, %s2146_s19  }
  0x24   : > { %s1837_s14 = smul.u32 (%p2230_p3), 48, %s2154_s21 }
  0x25   : > { %s1836_s15 = smul.u32 (%p2230_p3), 96, %s208_s13 }
  0x26   : > { %s216_s25 = scalar_lea.vmem (%p2230_p3), %s2454_s0, %s1837_s14 }
  0x27   : > { %v229_v0 = vld [vmem:[%s216_s25] sm:$0xff] (%p2230_p3)  ;;  %v231_v1 = vld [vmem:[%s216_s25 + $0x8] sm:$0xff] (%p2230_p3)  ;;  %v233_v2 = vld [vmem:[%s216_s25 + $0x10] sm:$0xff] (%p2230_p3)  ;;  %s210_s27 = scalar_lea.vmem (%p2230_p3), [#allocation3], %s1836_s15 }
  0x28   : > { %230 = vst [vmem:[%s210_s27] sm:$0xff] %v229_v0  ;;  %232 = vst [vmem:[%s210_s27 + $0x8] sm:$0xff] %v231_v1  ;;  %v235_v3 = vld [vmem:[%s216_s25 + $0x18] sm:$0xff]  ;;  %v237_v4 = vld [vmem:[%s216_s25 + $0x20] sm:$0xff] }
  0x29   : > { %234 = vst [vmem:[%s210_s27 + $0x10] sm:$0xff] %v233_v2  ;;  %v239_v5 = vld [vmem:[%s216_s25 + $0x28] sm:$0xff]  ;;  %236 = vst [vmem:[%s210_s27 + $0x18] sm:$0xff] %v235_v3  ;;  %v241_v6 = vld [vmem:[%s216_s25 + $0x90] sm:$0xff] }
  0x2a   : > { %238 = vst [vmem:[%s210_s27 + $0x20] sm:$0xff] %v237_v4  ;;  %240 = vst [vmem:[%s210_s27 + $0x28] sm:$0xff] %v239_v5  ;;  %v243_v7 = vld [vmem:[%s216_s25 + $0x98] sm:$0xff]  ;;  %v245_v8 = vld [vmem:[%s216_s25 + $0xa0] sm:$0xff] }
  0x2b   : > { %242 = vst [vmem:[%s210_s27 + $0x30] sm:$0xff] %v241_v6  ;;  %244 = vst [vmem:[%s210_s27 + $0x38] sm:$0xff] %v243_v7  ;;  %v247_v9 = vld [vmem:[%s216_s25 + $0xa8] sm:$0xff]  ;;  %v249_v10 = vld [vmem:[%s216_s25 + $0xb0] sm:$0xff] }
  0x2c   : > { %246 = vst [vmem:[%s210_s27 + $0x40] sm:$0xff] %v245_v8  ;;  %v251_v11 = vld [vmem:[%s216_s25 + $0xb8] sm:$0xff]  ;;  %248 = vst [vmem:[%s210_s27 + $0x48] sm:$0xff] %v247_v9 }
  0x2d   : > { %250 = vst [vmem:[%s210_s27 + $0x50] sm:$0xff] %v249_v10  ;;  %252 = vst [vmem:[%s210_s27 + $0x58] sm:$0xff] %v251_v11 }
  0x2e PF: > { %261 = sbr.rel (%p2238_p7) target bundleno = 672 (0x2a0), region = 59  ;;  %s264_s26 = sand.u32 (!%p2238_p7), 1, %s2142_s18  }
  0x2f   : > { %s1838_s6 = smul.u32 (!%p2238_p7), 96, %s264_s26 }
  0x31   : > { %s2269_s7 = scalar_lea.vmem (!%p2238_p7), [#allocation3], %s1838_s6 }
  0x33   : > { %2133 = dma.done.wait (%p2244_p8), [#allocation5], 12288  }
  0x34   : > { %2135 = vsyncadd (%p2244_p8), [#allocation5], 4294955008  ;;  %p1693_p3 = scmp.ne.s32.totalorder %s2150_s20, 0 }
  0x36   : > { %295 = sbr.rel (%p1693_p3) target bundleno = 61 (0x3d), region = 71 }
  0x3b   : > { %v2163_v12 = vmov 0.0  }
  0x3c   : > { %296 = vst [vmem:[#allocation2] sm:$0xff] %v2163_v12  ;;  %297 = vst [vmem:[#allocation2 + $0x8] sm:$0xf] %v2163_v12 }
  0x3d PF: > { %p1694_p7 = scmp.ge.s32.totalorder %s2150_s20, 2 }
  0x3f   : > { %301 = sbr.rel (%p1694_p7) target bundleno = 109 (0x6d), region = 75 }
  0x44   : > { %v302_v13 = vld [vmem:[%s2269_s7] sm:$0xff]  ;;  %v303_v14 = vld [vmem:[%s2269_s7 + $0x8] sm:$0xff]  ;;  %v304_v15 = vld [vmem:[%s2269_s7 + $0x10] sm:$0xff]  ;;  %v405_v22 = vlaneseq  ;;  %v2164_v28 = vmov 1983009808   ;;  %vm455_vm0 = vcmask 1041409  }
  0x45   : > { %v305_v16 = vld [vmem:[%s2269_s7 + $0x18] sm:$0xff]  ;;  %v308_v17 = vld [vmem:[%s2269_s7 + $0x30] sm:$0xff]  ;;  %v316_v19 = vrot.slane %v302_v13, 4  ;;  %v322_v20 = vrot.slane %v303_v14, 4  ;;  %v328_v21 = vrot.slane %v304_v15, 4  ;;  %v310_v23 = vld [vmem:[%s2269_s7 + $0x40] sm:$0xff]  ;;  %v403_v29 = vunpack.c.l.s4 %v2164_v28 }
  0x46   : > { %v309_v18 = vld [vmem:[%s2269_s7 + $0x38] sm:$0xff]  ;;  %v311_v24 = vld [vmem:[%s2269_s7 + $0x48] sm:$0xff]  ;;  %v334_v25 = vrot.slane %v305_v16, 4  ;;  %v352_v26 = vrot.slane %v308_v17, 4  ;;  %v364_v33 = vrot.slane %v310_v23, 4  ;;  %v306_v6 = vld [vmem:[%s2269_s7 + $0x20] sm:$0xff] }
  0x47   : > { %v358_v27 = vrot.slane %v309_v18, 4  ;;  %v317_v30 = vadd.f32 %v316_v19, %v302_v13  ;;  %v323_v31 = vadd.f32 %v322_v20, %v303_v14  ;;  %v329_v32 = vadd.f32 %v328_v21, %v304_v15  ;;  %v307_v11 = vld [vmem:[%s2269_s7 + $0x28] sm:$0xff]  ;;  %v312_v12 = vld [vmem:[%s2269_s7 + $0x50] sm:$0xff]  ;;  %v313_v13 = vld [vmem:[%s2269_s7 + $0x58] sm:$0xff] }
  0x48   : > { %v335_v34 = vadd.f32 %v334_v25, %v305_v16  ;;  %v353_v35 = vadd.f32 %v352_v26, %v308_v17  ;;  %v370_v37 = vrot.slane %v311_v24, 4  ;;  %v365_v41 = vadd.f32 %v364_v33, %v310_v23 }
  0x49   : > { %v359_v36 = vadd.f32 %v358_v27, %v309_v18  ;;  %v318_v38 = vrot.slane %v317_v30, 2  ;;  %v324_v39 = vrot.slane %v323_v31, 2  ;;  %v330_v40 = vrot.slane %v329_v32, 2 }
  0x4a   : > { %v336_v42 = vrot.slane %v335_v34, 2  ;;  %v354_v43 = vrot.slane %v353_v35, 2  ;;  %v371_v45 = vadd.f32 %v370_v37, %v311_v24  ;;  %v366_v49 = vrot.slane %v365_v41, 2 }
  0x4b   : > { %v360_v44 = vrot.slane %v359_v36, 2  ;;  %v319_v46 = vadd.f32 %v318_v38, %v317_v30  ;;  %v325_v47 = vadd.f32 %v324_v39, %v323_v31  ;;  %v331_v48 = vadd.f32 %v330_v40, %v329_v32 }
  0x4c   : > { %v337_v50 = vadd.f32 %v336_v42, %v335_v34  ;;  %v355_v51 = vadd.f32 %v354_v43, %v353_v35  ;;  %v372_v53 = vrot.slane %v371_v45, 2  ;;  %v367_v57 = vadd.f32 %v366_v49, %v365_v41 }
  0x4d   : > { %v361_v52 = vadd.f32 %v360_v44, %v359_v36  ;;  %v320_v54 = vrot.slane %v319_v46, 1  ;;  %v326_v55 = vrot.slane %v325_v47, 1  ;;  %v332_v56 = vrot.slane %v331_v48, 1 }
  0x4e   : > { %v338_v58 = vrot.slane %v337_v50, 1  ;;  %v356_v59 = vrot.slane %v355_v51, 1  ;;  %v373_v61 = vadd.f32 %v372_v53, %v371_v45  ;;  %v368_v1 = vrot.slane %v367_v57, 1 }
  0x4f   : > { %v362_v60 = vrot.slane %v361_v52, 1  ;;  %v321_v62 = vadd.f32 %v320_v54, %v319_v46  ;;  %v327_v63 = vadd.f32 %v326_v55, %v325_v47  ;;  %v333_v0 = vadd.f32 %v332_v56, %v331_v48  ;;  %v314_v47 = vld [vmem:[#allocation2] sm:$0xff] }
  0x50   : > { %v339_v2 = vadd.f32 %v338_v58, %v337_v50  ;;  %v357_v3 = vadd.f32 %v356_v59, %v355_v51  ;;  %v374_v5 = vrot.slane %v373_v61, 1  ;;  %v369_v7 = vadd.f32 %v368_v1, %v367_v57 }
  0x51   : > { %v363_v4 = vadd.f32 %v362_v60, %v361_v52  ;;  %v400_v8 = vcombine.low %v321_v62, %v327_v63  ;;  %v404_v9 = vunpack.c.0.s8 %v403_v29  ;;  %v406_v10 = vshrl.u32 %v405_v22, 7  ;;  %v315_v62 = vld [vmem:[#allocation2 + $0x8] sm:$0xf] }
  0x52   : > { %v375_v14 = vadd.f32 %v374_v5, %v373_v61  ;;  %v401_v15 = vcombine.low %v333_v0, %v339_v2  ;;  %v340_v18 = vrot.slane %v306_v6, 4  ;;  %v346_v20 = vrot.slane %v307_v11, 4 }
  0x53   : > { %v425_v16 = vcombine.low %v357_v3, %v363_v4  ;;  %v407_v17 = vsub.s32 %v404_v9, %v406_v10  ;;  %v376_v21 = vrot.slane %v312_v12, 4  ;;  %v382_v23 = vrot.slane %v313_v13, 4 }
  0x54   : > { %v426_v19 = vcombine.low %v369_v7, %v375_v14  ;;  %v341_v27 = vadd.f32 %v340_v18, %v306_v6  ;;  %v347_v30 = vadd.f32 %v346_v20, %v307_v11  ;;  %vm457_vm1 = vcmask 1043459  }
  0x55   : > { %v408_v24 = vrot.slane %v400_v8, %v407_v17  ;;  %v415_v25 = vrot.slane %v401_v15, %v407_v17  ;;  %v433_v26 = vrot.slane %v425_v16, %v407_v17  ;;  %v377_v29 = vadd.f32 %v376_v21, %v312_v12 }
  0x56   : > { %v440_v28 = vrot.slane %v426_v19, %v407_v17  ;;  %v383_v22 = vadd.f32 %v382_v23, %v313_v13  ;;  %v342_v32 = vrot.slane %v341_v27, 2  ;;  %v348_v34 = vrot.slane %v347_v30, 2 }
  0x57   : > { %v416_v31 = vcombine.low %v408_v24, %v415_v25  ;;  %v378_v35 = vrot.slane %v377_v29, 2  ;;  %vm459_vm2 = vcmask 1045509   ;;  %vm461_vm3 = vcmask 1047559  }
  0x58   : > { %v441_v33 = vcombine.low %v433_v26, %v440_v28  ;;  %v384_v36 = vrot.slane %v383_v22, 2  ;;  %v343_v37 = vadd.f32 %v342_v32, %v341_v27  ;;  %v349_v39 = vadd.f32 %v348_v34, %v347_v30 }
  0x59   : > { %v379_v40 = vadd.f32 %v378_v35, %v377_v29 }
  0x5a   : > { %v454_v38 = vrot.slane %v441_v33, 7  ;;  %v385_v41 = vadd.f32 %v384_v36, %v383_v22  ;;  %v344_v42 = vrot.slane %v343_v37, 1  ;;  %v350_v44 = vrot.slane %v349_v39, 1 }
  0x5b   : > { %v380_v45 = vrot.slane %v379_v40, 1 }
  0x5c   : > { %v456_v43 = vsel %vm455_vm0, %v454_v38, %v416_v31  ;;  %v386_v46 = vrot.slane %v385_v41, 1  ;;  %v345_v49 = vadd.f32 %v344_v42, %v343_v37  ;;  %v351_v51 = vadd.f32 %v350_v44, %v349_v39 }
  0x5d   : > { %v458_v48 = vsel %vm457_vm1, %v454_v38, %v456_v43  ;;  %v381_v52 = vadd.f32 %v380_v45, %v379_v40 }
  0x5e   : > { %v460_v50 = vsel %vm459_vm2, %v454_v38, %v458_v48  ;;  %v387_v53 = vadd.f32 %v386_v46, %v385_v41  ;;  %v417_v56 = vcombine.low %v345_v49, %v351_v51 }
  0x5f   : > { %v462_v54 = vsel %vm461_vm3, %v454_v38, %v460_v50 }
  0x60   : > { %v472_v55 = vadd.f32 %v462_v54, %v314_v47  ;;  %v442_v57 = vcombine.low %v381_v52, %v387_v53  ;;  %v424_v58 = vrot.slane %v417_v56, %v407_v17 }
  0x62   : > { %474 = vst [vmem:[#allocation2] sm:$0xff] %v472_v55  ;;  %v449_v59 = vrot.slane %v442_v57, %v407_v17 }
  0x64   : > { %v465_v60 = vrot.slane %v449_v59, 7 }
  0x66   : > { %v466_v61 = vsel %vm455_vm0, %v465_v60, %v424_v58 }
  0x67   : > { %v467_v63 = vsel %vm457_vm1, %v465_v60, %v466_v61 }
  0x68   : > { %v468_v0 = vsel %vm459_vm2, %v465_v60, %v467_v63 }
  0x69   : > { %v469_v1 = vsel %vm461_vm3, %v465_v60, %v468_v0 }
  0x6a   : > { %v473_v2 = vadd.f32 %v469_v1, %v315_v62 }
  0x6c   : > { %475 = vst [vmem:[#allocation2 + $0x8] sm:$0xf] %v473_v2 }
  0x6d PF: > { %p1695_p8 = scmp.ne.s32.totalorder %s2150_s20, 2 }
  0x6e   : > { %s1696_s18 = sshll.u32 (!%p1695_p8), %s2150_s20, 3 }
  0x6f   : > { %479 = sbr.rel (%p1695_p8) target bundleno = 657 (0x291), region = 79 }
  0x74   : > { %v1902_v3 = vld [vmem:[#allocation4 + $0x74] ss:$8 sps:$4 sm:$0xff]   ;;  %v1904_v4 = vld [vmem:[#allocation4 + $0x70] ss:$8 sps:$4 sm:$0xff]   ;;  %v1908_v7 = vld [vmem:[#allocation4 + $0x64] ss:$8 sps:$4 sm:$0xff]   ;;  %v492_v36 = vlaneseq  ;;  %v495_v43 = vstv %s1696_s18 }
  0x75   : > { %1303 = vmatprep.subr.bf16.mxu0 %v1902_v3  ;;  %v1905_v5 = vld [vmem:[#allocation4 + $0x174] ss:$8 sps:$4 sm:$0xff]   ;;  %v1907_v6 = vld [vmem:[#allocation4 + $0x170] ss:$8 sps:$4 sm:$0xff]   ;;  %v1910_v8 = vld [vmem:[#allocation4 + $0x60] ss:$8 sps:$4 sm:$0xff]  }
  0x76   : > { %1304 = vmatpush1.bf16.msra.mxu0 %v1904_v4  ;;  %1344 = vmatprep.subr.bf16.mxu1 %v1905_v5  ;;  %v1911_v9 = vld [vmem:[#allocation4 + $0x164] ss:$8 sps:$4 sm:$0xff]   ;;  %v1913_v10 = vld [vmem:[#allocation4 + $0x160] ss:$8 sps:$4 sm:$0xff]   ;;  %v1914_v11 = vld [vmem:[#allocation4 + $0x54] ss:$8 sps:$4 sm:$0xff]  }
  0x77   : > { %1345 = vmatpush1.bf16.msra.mxu1 %v1907_v6  ;;  %1305 = vmatprep.subr.bf16.mxu0 %v1908_v7  ;;  %v1916_v12 = vld [vmem:[#allocation4 + $0x50] ss:$8 sps:$4 sm:$0xff]   ;;  %v1917_v13 = vld [vmem:[#allocation4 + $0x154] ss:$8 sps:$4 sm:$0xff]   ;;  %v1920_v14 = vld [vmem:[#allocation4 + $0x44] ss:$8 sps:$4 sm:$0xff]  }
  0x78   : > { %1346 = vmatprep.subr.bf16.mxu1 %v1911_v9  ;;  %v1919_v15 = vld [vmem:[#allocation4 + $0x150] ss:$8 sps:$4 sm:$0xff]   ;;  %v1923_v16 = vld [vmem:[#allocation4 + $0x144] ss:$8 sps:$4 sm:$0xff]   ;;  %v1922_v17 = vld [vmem:[#allocation4 + $0x40] ss:$8 sps:$4 sm:$0xff]  }
  0x79   : > { %v1926_v18 = vld [vmem:[#allocation4 + $0x34] ss:$8 sps:$4 sm:$0xff]   ;;  %v1925_v19 = vld [vmem:[#allocation4 + $0x140] ss:$8 sps:$4 sm:$0xff]   ;;  %v1928_v21 = vld [vmem:[#allocation4 + $0x30] ss:$8 sps:$4 sm:$0xff]  }
  0x7a   : > { %1306 = vmatpush1.bf16.msra.mxu0 %v1910_v8  ;;  %v1929_v20 = vld [vmem:[#allocation4 + $0x134] ss:$8 sps:$4 sm:$0xff]   ;;  %v1932_v23 = vld [vmem:[#allocation4 + $0x24] ss:$8 sps:$4 sm:$0xff]   ;;  %v1931_v24 = vld [vmem:[#allocation4 + $0x130] ss:$8 sps:$4 sm:$0xff]  }
  0x7b   : > { %1307 = vmatprep.subr.bf16.mxu0 %v1914_v11  ;;  %1347 = vmatpush1.bf16.msra.mxu1 %v1913_v10  ;;  %v1935_v25 = vld [vmem:[#allocation4 + $0x124] ss:$8 sps:$4 sm:$0xff]   ;;  %v1934_v26 = vld [vmem:[#allocation4 + $0x20] ss:$8 sps:$4 sm:$0xff]   ;;  %v1938_v27 = vld [vmem:[#allocation4 + $0x14] ss:$8 sps:$4 sm:$0xff]  }
  0x7c   : > { %1348 = vmatprep.subr.bf16.mxu1 %v1917_v13  ;;  %v1937_v28 = vld [vmem:[#allocation4 + $0x120] ss:$8 sps:$4 sm:$0xff]   ;;  %v1941_v30 = vld [vmem:[#allocation4 + $0x114] ss:$8 sps:$4 sm:$0xff]   ;;  %v1940_v29 = vld [vmem:[#allocation4 + $0x10] ss:$8 sps:$4 sm:$0xff]  }
  0x7d   : > { %v1944_v22 = vld [vmem:[#allocation4 + $0x4] ss:$8 sps:$4 sm:$0xff]   ;;  %v1943_v31 = vld [vmem:[#allocation4 + $0x110] ss:$8 sps:$4 sm:$0xff]   ;;  %v1946_v33 = vld [vmem:[#allocation4] ss:$8 sps:$4 sm:$0xff]  }
  0x7e   : > { %1308 = vmatpush1.bf16.msra.mxu0 %v1916_v12  ;;  %v1947_v32 = vld [vmem:[#allocation4 + $0x104] ss:$8 sps:$4 sm:$0xff]   ;;  %v1950_v34 = vld [vmem:[#allocation4 + $0xf4] ss:$8 sps:$4 sm:$0xff]   ;;  %v1949_v35 = vld [vmem:[#allocation4 + $0x100] ss:$8 sps:$4 sm:$0xff]  }
  0x7f   : > { %1309 = vmatprep.subr.bf16.mxu0 %v1920_v14  ;;  %1349 = vmatpush1.bf16.msra.mxu1 %v1919_v15  ;;  %v1953_v37 = vld [vmem:[#allocation4 + $0x1f4] ss:$8 sps:$4 sm:$0xff]   ;;  %v1952_v38 = vld [vmem:[#allocation4 + $0xf0] ss:$8 sps:$4 sm:$0xff]   ;;  %v1956_v39 = vld [vmem:[#allocation4 + $0xe4] ss:$8 sps:$4 sm:$0xff]  }
  0x80   : > { %1350 = vmatprep.subr.bf16.mxu1 %v1923_v16  ;;  %v1955_v40 = vld [vmem:[#allocation4 + $0x1f0] ss:$8 sps:$4 sm:$0xff]   ;;  %v2299_v41 = vshrl.u32 %v492_v36, 7  ;;  %v1959_v42 = vld [vmem:[#allocation4 + $0x1e4] ss:$8 sps:$4 sm:$0xff]   ;;  %vm651_vm5 = vcmask 1041409  }
  0x81   : > { %v1958_v44 = vld [vmem:[#allocation4 + $0xe0] ss:$8 sps:$4 sm:$0xff]   ;;  %v1962_v45 = vld [vmem:[#allocation4 + $0xd4] ss:$8 sps:$4 sm:$0xff]   ;;  %v1964_v49 = vld [vmem:[#allocation4 + $0xd0] ss:$8 sps:$4 sm:$0xff]  }
  0x82   : > { %1310 = vmatpush1.bf16.msra.mxu0 %v1922_v17  ;;  %v1961_v46 = vld [vmem:[#allocation4 + $0x1e0] ss:$8 sps:$4 sm:$0xff]   ;;  %v2302_v47 = vadd.s32 %v495_v43, %v2299_v41  ;;  %v1965_v48 = vld [vmem:[#allocation4 + $0x1d4] ss:$8 sps:$4 sm:$0xff]   ;;  %v1967_v50 = vld [vmem:[#allocation4 + $0x1d0] ss:$8 sps:$4 sm:$0xff]  }
  0x83   : > { %1311 = vmatprep.subr.bf16.mxu0 %v1926_v18  ;;  %1351 = vmatpush1.bf16.msra.mxu1 %v1925_v19  ;;  %v1968_v51 = vld [vmem:[#allocation4 + $0xc4] ss:$8 sps:$4 sm:$0xff]   ;;  %v2165_v52 = vmov 1983009808   ;;  %v1970_v54 = vld [vmem:[#allocation4 + $0xc0] ss:$8 sps:$4 sm:$0xff]  }
  0x84   : > { %1352 = vmatprep.subr.bf16.mxu1 %v1929_v20  ;;  %v2304_v53 = vunpack.c.l.s4 %v2165_v52  ;;  %v1971_v55 = vld [vmem:[#allocation4 + $0x1c4] ss:$8 sps:$4 sm:$0xff]   ;;  %vm497_vm4 = vcmp.lt.s32.totalorder %v2302_v47, 20  ;;  %v1974_v56 = vld [vmem:[#allocation4 + $0xb4] ss:$8 sps:$4 sm:$0xff]   ;;  %vm653_vm6 = vcmask 1043459  }
  0x85   : > { %v480_v57 = vld [vmem:[%s2269_s7] sm:$0xff]  ;;  %v481_v58 = vld [vmem:[%s2269_s7 + $0x8] sm:$0xff]  ;;  %v482_v60 = vld [vmem:[%s2269_s7 + $0x10] sm:$0xff]  ;;  %vm655_vm7 = vcmask 1045509   ;;  %vm657_vm8 = vcmask 1047559  }
  0x86   : > { %1312 = vmatpush1.bf16.msra.mxu0 %v1928_v21  ;;  %v1973_v59 = vld [vmem:[#allocation4 + $0x1c0] ss:$8 sps:$4 sm:$0xff]   ;;  %v483_v61 = vld [vmem:[%s2269_s7 + $0x18] sm:$0xff]  ;;  %v486_v62 = vld [vmem:[%s2269_s7 + $0x30] sm:$0xff]  ;;  %v498_v63 = vsel %vm497_vm4, %v480_v57, 0.0  ;;  %v499_v0 = vsel %vm497_vm4, %v481_v58, 0.0  ;;  %v600_v7 = vunpack.c.0.s8 %v2304_v53 }
  0x87   : > { %1313 = vmatprep.subr.bf16.mxu0 %v1932_v23  ;;  %1353 = vmatpush1.bf16.msra.mxu1 %v1931_v24  ;;  %v487_v1 = vld [vmem:[%s2269_s7 + $0x38] sm:$0xff]  ;;  %v488_v2 = vld [vmem:[%s2269_s7 + $0x40] sm:$0xff]  ;;  %v489_v3 = vld [vmem:[%s2269_s7 + $0x48] sm:$0xff]  ;;  %v500_v4 = vsel %vm497_vm4, %v482_v60, 0.0  ;;  %v501_v5 = vsel %vm497_vm4, %v483_v61, 0.0  ;;  %v504_v6 = vsel %vm497_vm4, %v486_v62, 0.0 }
  0x88   : > { %1354 = vmatprep.subr.bf16.mxu1 %v1935_v25  ;;  %v505_v8 = vsel %vm497_vm4, %v487_v1, 0.0  ;;  %v506_v9 = vsel %vm497_vm4, %v488_v2, 0.0  ;;  %v507_v10 = vsel %vm497_vm4, %v489_v3, 0.0  ;;  %v512_v11 = vrot.slane %v498_v63, 4  ;;  %v1977_v12 = vld [vmem:[#allocation4 + $0x1b4] ss:$8 sps:$4 sm:$0xff]  }
  0x89   : > { %v518_v13 = vrot.slane %v499_v0, 4  ;;  %v524_v14 = vrot.slane %v500_v4, 4  ;;  %v530_v15 = vrot.slane %v501_v5, 4  ;;  %v548_v16 = vrot.slane %v504_v6, 4  ;;  %v1976_v17 = vld [vmem:[#allocation4 + $0xb0] ss:$8 sps:$4 sm:$0xff]  }
  0x8a   : > { %1314 = vmatpush1.bf16.msra.mxu0 %v1934_v26  ;;  %v513_v18 = vadd.f32 %v512_v11, %v498_v63  ;;  %v554_v19 = vrot.slane %v505_v8, 4  ;;  %v560_v20 = vrot.slane %v506_v9, 4  ;;  %v566_v21 = vrot.slane %v507_v10, 4  ;;  %v1980_v23 = vld [vmem:[#allocation4 + $0xa4] ss:$8 sps:$4 sm:$0xff]  }
  0x8b   : > { %1315 = vmatprep.subr.bf16.mxu0 %v1938_v27  ;;  %1355 = vmatpush1.bf16.msra.mxu1 %v1937_v28  ;;  %v519_v24 = vadd.f32 %v518_v13, %v499_v0  ;;  %v525_v25 = vadd.f32 %v524_v14, %v500_v4  ;;  %v531_v26 = vadd.f32 %v530_v15, %v501_v5  ;;  %v1979_v28 = vld [vmem:[#allocation4 + $0x1b0] ss:$8 sps:$4 sm:$0xff]   ;;  %v1985_v43 = vld [vmem:[#allocation4 + $0x1a0] ss:$8 sps:$4 sm:$0xff]   ;;  %v1992_v1 = vld [vmem:[#allocation4 + $0x84] ss:$8 sps:$4 sm:$0xff]  }
  0x8c   : > { %1356 = vmatprep.subr.bf16.mxu1 %v1941_v30  ;;  %v549_v27 = vadd.f32 %v548_v16, %v504_v6  ;;  %v1983_v30 = vld [vmem:[#allocation4 + $0x1a4] ss:$8 sps:$4 sm:$0xff]   ;;  %v1991_v6 = vld [vmem:[#allocation4 + $0x190] ss:$8 sps:$4 sm:$0xff]   ;;  %v2335_v11 = vsub.s32 %v600_v7, %v2299_v41  ;;  %v1994_v15 = vld [vmem:[#allocation4 + $0x80] ss:$8 sps:$4 sm:$0xff]  }
  0x8d   : > { %v1997_v7 = vld [vmem:[#allocation4 + $0x180] ss:$8 sps:$4 sm:$0xff]  }
  0x8e   : > { %1316 = vmatpush1.bf16.msra.mxu0 %v1940_v29  ;;  %v514_v29 = vrot.slane %v513_v18, 2  ;;  %v550_v36 = vrot.slane %v549_v27, 2 }
  0x8f   : > { %1317 = vmatprep.subr.bf16.mxu0 %v1944_v22  ;;  %1357 = vmatpush1.bf16.msra.mxu1 %v1943_v31  ;;  %v555_v22 = vadd.f32 %v554_v19, %v505_v8  ;;  %v561_v31 = vadd.f32 %v560_v20, %v506_v9  ;;  %v2000_v20 = vld [vmem:[#allocation4 + $0x274] ss:$8 sps:$4 sm:$0xff]  }
  0x90   : > { %1358 = vmatprep.subr.bf16.mxu1 %v1947_v32  ;;  %v567_v32 = vadd.f32 %v566_v21, %v507_v10 }
  0x92   : > { %1318 = vmatpush1.bf16.msra.mxu0 %v1946_v33  ;;  %v520_v33 = vrot.slane %v519_v24, 2 }
  0x93   : > { %1319 = vmatprep.subr.bf16.mxu0 %v1950_v34  ;;  %1359 = vmatpush1.bf16.msra.mxu1 %v1949_v35  ;;  %v526_v34 = vrot.slane %v525_v25, 2  ;;  %v532_v35 = vrot.slane %v531_v26, 2 }
  0x94   : > { %1360 = vmatprep.subr.bf16.mxu1 %v1953_v37  ;;  %v1982_v37 = vld [vmem:[#allocation4 + $0xa0] ss:$8 sps:$4 sm:$0xff]  }
  0x96   : > { %1320 = vmatpush2.bf16.msra.mxu0 %v1952_v38  ;;  %v515_v38 = vadd.f32 %v514_v29, %v513_v18  ;;  %v484_v29 = vld [vmem:[%s2269_s7 + $0x20] sm:$0xff] }
  0x97   : > { %1321 = vmatprep.subr.bf16.mxu0 %v1956_v39  ;;  %1361 = vmatpush2.bf16.msra.mxu1 %v1955_v40  ;;  %v556_v39 = vrot.slane %v555_v22, 2  ;;  %v562_v40 = vrot.slane %v561_v31, 2 }
  0x98   : > { %1362 = vmatprep.subr.bf16.mxu1 %v1959_v42  ;;  %v568_v42 = vrot.slane %v567_v32, 2 }
  0x99   : > { %v557_v52 = vadd.f32 %v556_v39, %v555_v22 }
  0x9a   : > { %1322 = vmatpush2.bf16.msra.mxu0 %v1958_v44  ;;  %v1986_v44 = vld [vmem:[#allocation4 + $0x94] ss:$8 sps:$4 sm:$0xff]  }
  0x9b   : > { %1323 = vmatprep.subr.bf16.mxu0 %v1962_v45  ;;  %1363 = vmatpush2.bf16.msra.mxu1 %v1961_v46  ;;  %v521_v45 = vadd.f32 %v520_v33, %v519_v24  ;;  %v527_v46 = vadd.f32 %v526_v34, %v525_v25  ;;  %v558_v62 = vrot.slane %v557_v52, 1  ;;  %v491_v33 = vld [vmem:[%s2269_s7 + $0x58] sm:$0xff]  ;;  %v502_v34 = vsel %vm497_vm4, %v484_v29, 0.0 }
  0x9c   : > { %1364 = vmatprep.subr.bf16.mxu1 %v1965_v48  ;;  %v533_v48 = vadd.f32 %v532_v35, %v531_v26  ;;  %v536_v39 = vrot.slane %v502_v34, 4 }
  0x9d   : > { %v522_v57 = vrot.slane %v521_v45, 1  ;;  %v528_v58 = vrot.slane %v527_v46, 1  ;;  %v559_v8 = vadd.f32 %v558_v62, %v557_v52 }
  0x9e   : > { %1324 = vmatpush2.bf16.msra.mxu0 %v1964_v49  ;;  %v551_v49 = vadd.f32 %v550_v36, %v549_v27  ;;  %v510_v27 = vld [vmem:[#allocation2] sm:$0xff] }
  0x9f   : > { %1325 = vmatprep.subr.bf16.mxu0 %v1968_v51  ;;  %1365 = vmatpush2.bf16.msra.mxu1 %v1967_v50  ;;  %v1988_v50 = vld [vmem:[#allocation4 + $0x90] ss:$8 sps:$4 sm:$0xff]   ;;  %v516_v51 = vrot.slane %v515_v38, 1  ;;  %v523_v2 = vadd.f32 %v522_v57, %v521_v45  ;;  %v529_v3 = vadd.f32 %v528_v58, %v527_v46  ;;  %v537_v45 = vadd.f32 %v536_v39, %v502_v34  ;;  %v2019_v39 = vld [vmem:[#allocation4 + $0x200] ss:$8 sps:$4 sm:$0xff]  }
  0xa0   : > { %1366 = vmatprep.subr.bf16.mxu1 %v1971_v55  ;;  %v569_v55 = vadd.f32 %v568_v42, %v567_v32  ;;  %v552_v60 = vrot.slane %v551_v49, 1  ;;  %v490_v32 = vld [vmem:[%s2269_s7 + $0x50] sm:$0xff] }
  0xa1   : > { %v517_v61 = vadd.f32 %v516_v51, %v515_v38  ;;  %v509_v38 = vsel %vm497_vm4, %v491_v33, 0.0  ;;  %v538_v52 = vrot.slane %v537_v45, 2  ;;  %v1998_v58 = vld [vmem:[#allocation4 + $0x270] ss:$8 sps:$4 sm:$0xff]   ;;  %v2018_v33 = vld [vmem:[#allocation4 + $0x214] ss:$8 sps:$4 sm:$0xff]  }
  0xa2   : > { %1326 = vmatpush2.bf16.msra.mxu0 %v1970_v54  ;;  %v563_v54 = vadd.f32 %v562_v40, %v561_v31  ;;  %v570_v0 = vrot.slane %v569_v55, 1  ;;  %v553_v5 = vadd.f32 %v552_v60, %v551_v49  ;;  %v485_v31 = vld [vmem:[%s2269_s7 + $0x28] sm:$0xff]  ;;  %v2016_v34 = vld [vmem:[#allocation4 + $0x210] ss:$8 sps:$4 sm:$0xff]  }
  0xa3   : > { %1327 = vmatprep.subr.bf16.mxu0 %v1974_v56  ;;  %1367 = vmatpush2.bf16.msra.mxu1 %v1973_v59  ;;  %v1989_v56 = vld [vmem:[#allocation4 + $0x194] ss:$8 sps:$4 sm:$0xff]   ;;  %v534_v59 = vrot.slane %v533_v48, 1  ;;  %v596_v13 = vcombine.low %v517_v61, %v523_v2  ;;  %v503_v36 = vsel %vm497_vm4, %v485_v31, 0.0  ;;  %v2003_v60 = vld [vmem:[#allocation4 + $0x264] ss:$8 sps:$4 sm:$0xff]   ;;  %v539_v61 = vadd.f32 %v538_v52, %v537_v45 }
  0xa4   : > { %1368 = vmatprep.subr.bf16.mxu1 %v1977_v12  ;;  %v564_v63 = vrot.slane %v563_v54, 1  ;;  %v571_v10 = vadd.f32 %v570_v0, %v569_v55  ;;  %v1995_v12 = vld [vmem:[#allocation4 + $0x184] ss:$8 sps:$4 sm:$0xff]   ;;  %v621_v16 = vcombine.low %v553_v5, %v559_v8  ;;  %v542_v40 = vrot.slane %v503_v36, 4  ;;  %v2034_v52 = vld [vmem:[#allocation4 + $0x2b0] ss:$8 sps:$4 sm:$0xff]  }
  0xa5   : > { %v535_v4 = vadd.f32 %v534_v59, %v533_v48  ;;  %v604_v18 = vrot.slane %v596_v13, %v2335_v11  ;;  %v2015_v31 = vld [vmem:[#allocation4 + $0x224] ss:$8 sps:$4 sm:$0xff]  }
  0xa6   : > { %1328 = vmatpush2.bf16.msra.mxu0 %v1976_v17  ;;  %v565_v9 = vadd.f32 %v564_v63, %v563_v54  ;;  %v629_v21 = vrot.slane %v621_v16, %v2335_v11  ;;  %v543_v46 = vadd.f32 %v542_v40, %v503_v36  ;;  %v2021_v36 = vld [vmem:[#allocation4 + $0x204] ss:$8 sps:$4 sm:$0xff]   ;;  %v2024_v40 = vld [vmem:[#allocation4 + $0x2f4] ss:$8 sps:$4 sm:$0xff]  }
  0xa7   : > { %1329 = vmatprep.subr.bf16.mxu0 %v1980_v23  ;;  %1369 = vmatpush2.bf16.msra.mxu1 %v1979_v28  ;;  %v597_v14 = vcombine.low %v529_v3, %v535_v4  ;;  %v540_v4 = vrot.slane %v539_v61, 1  ;;  %v2027_v45 = vld [vmem:[#allocation4 + $0x2e4] ss:$8 sps:$4 sm:$0xff]  }
  0xa8   : > { %1370 = vmatprep.subr.bf16.mxu1 %v1983_v30  ;;  %v622_v17 = vcombine.low %v565_v9, %v571_v10  ;;  %v544_v54 = vrot.slane %v543_v46, 2  ;;  %v2001_v10 = vld [vmem:[#allocation4 + $0x260] ss:$8 sps:$4 sm:$0xff]  }
  0xa9   : > { %v611_v19 = vrot.slane %v597_v14, %v2335_v11  ;;  %v541_v13 = vadd.f32 %v540_v4, %v539_v61  ;;  %v2047_v61 = vld [vmem:[%s2457_s3 + $0x38] sm:$0xff]  }
  0xaa   : > { %1330 = vmatpush2.bf16.msra.mxu0 %v1982_v37  ;;  %v636_v53 = vrot.slane %v622_v17, %v2335_v11  ;;  %v508_v37 = vsel %vm497_vm4, %v490_v32, 0.0  ;;  %v545_v62 = vadd.f32 %v544_v54, %v543_v46  ;;  %v2013_v32 = vld [vmem:[#allocation4 + $0x220] ss:$8 sps:$4 sm:$0xff]   ;;  %v2039_v54 = vld [vmem:[#allocation4 + $0x2a4] ss:$8 sps:$4 sm:$0xff]  }
  0xab   : > { %1331 = vmatprep.subr.bf16.mxu0 %v1986_v44  ;;  %1371 = vmatpush2.bf16.msra.mxu1 %v1985_v43  ;;  %v612_v23 = vcombine.low %v604_v18, %v611_v19  ;;  %v572_v42 = vrot.slane %v508_v37, 4  ;;  %v578_v43 = vrot.slane %v509_v38, 4  ;;  %v2025_v46 = vld [vmem:[#allocation4 + $0x2e0] ss:$8 sps:$4 sm:$0xff]   ;;  %v2054_v4 = vld [vmem:[%s2457_s3 + $0x58] sm:$0xff]  }
  0xac   : > { %1372 = vmatprep.subr.bf16.mxu1 %v1989_v56  ;;  %v637_v24 = vcombine.low %v629_v21, %v636_v53  ;;  %v546_v5 = vrot.slane %v545_v62, 1  ;;  %v2004_v21 = vld [vmem:[#allocation4 + $0x250] ss:$8 sps:$4 sm:$0xff]   ;;  %v2009_v53 = vld [vmem:[#allocation4 + $0x244] ss:$8 sps:$4 sm:$0xff]  }
  0xad   : > { %v573_v48 = vadd.f32 %v572_v42, %v508_v37  ;;  %v579_v49 = vadd.f32 %v578_v43, %v509_v38 }
  0xae   : > { %1332 = vmatpush2.bf16.msra.mxu0 %v1988_v50  ;;  %v650_v25 = vrot.slane %v637_v24, 7  ;;  %v547_v14 = vadd.f32 %v546_v5, %v545_v62  ;;  %v2007_v24 = vld [vmem:[#allocation4 + $0x240] ss:$8 sps:$4 sm:$0xff]   ;;  %v2055_v5 = vld [vmem:[%s2457_s3 + $0x18] sm:$0xff]  }
  0xaf   : > { %1333 = vmatprep.subr.bf16.mxu0 %v1992_v1  ;;  %1373 = vmatpush2.bf16.msra.mxu1 %v1991_v6  ;;  %v574_v55 = vrot.slane %v573_v48, 2  ;;  %v580_v56 = vrot.slane %v579_v49, 2  ;;  %v2048_v62 = vld [vmem:[%s2457_s3 + $0x70] sm:$0xff]  }
  0xb0   : > { %1374 = vmatprep.subr.bf16.mxu1 %v1995_v12  ;;  %v652_v26 = vsel %vm651_vm5, %v650_v25, %v612_v23  ;;  %v2006_v12 = vld [vmem:[#allocation4 + $0x254] ss:$8 sps:$4 sm:$0xff]   ;;  %v613_v17 = vcombine.low %v541_v13, %v547_v14 }
  0xb1   : > { %v654_v28 = vsel %vm653_vm6, %v650_v25, %v652_v26  ;;  %v575_v63 = vadd.f32 %v574_v55, %v573_v48  ;;  %v581_v0 = vadd.f32 %v580_v56, %v579_v49  ;;  %v2030_v48 = vld [vmem:[#allocation4 + $0x2d4] ss:$8 sps:$4 sm:$0xff]   ;;  %v2028_v49 = vld [vmem:[#allocation4 + $0x2d0] ss:$8 sps:$4 sm:$0xff]   ;;  %v2037_v55 = vld [vmem:[#allocation4 + $0x2a0] ss:$8 sps:$4 sm:$0xff]  }
  0xb2   : > { %1334 = vmatpush2.bf16.msra.mxu0 %v1994_v15  ;;  %v656_v30 = vsel %vm655_vm7, %v650_v25, %v654_v28  ;;  %v620_v19 = vrot.slane %v613_v17, %v2335_v11  ;;  %v2042_v56 = vld [vmem:[#allocation4 + $0x294] ss:$8 sps:$4 sm:$0xff]  }
  0xb3   : > { %1385 = vmatprep.subr.bf16.mxu0 %v2000_v20  ;;  %1375 = vmatpush2.bf16.msra.mxu1 %v1997_v7  ;;  %v658_v22 = vsel %vm657_vm8, %v650_v25, %v656_v30  ;;  %v576_v6 = vrot.slane %v575_v63, 1  ;;  %v582_v8 = vrot.slane %v581_v0, 1  ;;  %v511_v25 = vld [vmem:[#allocation2 + $0x8] sm:$0xf]  ;;  %v2061_v13 = vld [vmem:[%s2457_s3] sm:$0xff]  }
  0xb4   : > { %v668_v35 = vadd.f32 %v658_v22, %v510_v27  ;;  %v2012_v27 = vld [vmem:[#allocation4 + $0x234] ss:$8 sps:$4 sm:$0xff]   ;;  %v2010_v22 = vld [vmem:[#allocation4 + $0x230] ss:$8 sps:$4 sm:$0xff]  }
  0xb5   : > { %v577_v15 = vadd.f32 %v576_v6, %v575_v63  ;;  %v583_v16 = vadd.f32 %v582_v8, %v581_v0  ;;  %v2049_v63 = vld [vmem:[%s2457_s3 + $0x30] sm:$0xff]   ;;  %v2050_v0 = vld [vmem:[%s2457_s3 + $0x68] sm:$0xff]  }
  0xb6   : > { %670 = vst [vmem:[#allocation2] sm:$0xff] %v668_v35  ;;  %v674_v44 = vmul.f32 0.05, %v668_v35  ;;  %v2056_v6 = vld [vmem:[%s2457_s3 + $0x50] sm:$0xff]  }
  0xb7   : > { %v638_v18 = vcombine.low %v577_v15, %v583_v16  ;;  %v2057_v8 = vld [vmem:[%s2457_s3 + $0x10] sm:$0xff]  }
  0xb8   : > { %v685_v50 = vrot.slane %v674_v44, %v2335_v11  ;;  %v678_v51 = vcombine.high %v674_v44, %v674_v44  ;;  %v2022_v44 = vld [vmem:[#allocation4 + $0x2f0] ss:$8 sps:$4 sm:$0xff]  }
  0xb9   : > { %v645_v20 = vrot.slane %v638_v18, %v2335_v11 }
  0xba   : > { %v693_v57 = vcombine.high %v685_v50, %v685_v50  ;;  %v709_v47 = vpack.c.bf16 %v685_v50, %v685_v50  ;;  %v692_v59 = vrot.slane %v678_v51, %v2335_v11  ;;  %v2033_v50 = vld [vmem:[#allocation4 + $0x2c4] ss:$8 sps:$4 sm:$0xff]   ;;  %v2036_v51 = vld [vmem:[#allocation4 + $0x2b4] ss:$8 sps:$4 sm:$0xff]  }
  0xbb   : > { %v661_v7 = vrot.slane %v645_v20, 7 }
  0xbc   : > { %v710_v1 = vpack.c.bf16 %v693_v57, %v693_v57  ;;  %v694_v2 = vcombine.high %v692_v59, %v692_v59  ;;  %v711_v3 = vpack.c.bf16 %v692_v59, %v692_v59  ;;  %v2040_v57 = vld [vmem:[#allocation4 + $0x290] ss:$8 sps:$4 sm:$0xff]  }
  0xbd   : > { %v662_v23 = vsel %vm651_vm5, %v661_v7, %v620_v19 }
  0xbe   : > { %1335 = vmatprep.mubr.bf16.mxu0 %v710_v1  ;;  %v712_v9 = vpack.c.bf16 %v694_v2, %v694_v2  ;;  %v663_v26 = vsel %vm653_vm6, %v661_v7, %v662_v23  ;;  %v2051_v1 = vld [vmem:[%s2457_s3 + $0x28] sm:$0xff]   ;;  %v2052_v2 = vld [vmem:[%s2457_s3 + $0x60] sm:$0xff]   ;;  %v819_v23 = vsub.s32 1, %v2299_v41 }
  0xbf   : > { %1336 = vmatmul.mubr.bf16.vlgmr.msra.gmra.mxu0 %v709_v47  ;;  %v664_v28 = vsel %vm655_vm7, %v661_v7, %v663_v26  ;;  %v2045_v47 = vld [vmem:[#allocation4 + $0x284] ss:$8 sps:$4 sm:$0xff]  }
  0xc0   : > { %1376 = vmatprep.mubr.bf16.mxu1 %v712_v9  ;;  %1386 = vmatpush1.bf16.msra.mxu0 %v1998_v58  ;;  %v665_v30 = vsel %vm657_vm8, %v661_v7, %v664_v28  ;;  %v2043_v58 = vld [vmem:[#allocation4 + $0x280] ss:$8 sps:$4 sm:$0xff]   ;;  %v811_v7 = vld [vmem:[%s2456_s2] sm:$0x3] }
  0xc1   : > { %1377 = vmatmul.mubr.bf16.vlgmr.msra.gmra.mxu1 %v711_v3  ;;  %1387 = vmatprep.subr.bf16.mxu0 %v2003_v60  ;;  %v669_v29 = vadd.f32 %v665_v30, %v511_v25  ;;  %v2046_v60 = vld [vmem:[%s2457_s3 + $0x78] sm:$0xff]   ;;  %v2053_v3 = vld [vmem:[%s2457_s3 + $0x20] sm:$0xff]   ;;  %v2058_v9 = vld [vmem:[%s2457_s3 + $0x48] sm:$0xff]   ;;  %v820_v25 = vrot.slane %v811_v7, %v819_v23 }
  0xc2   : > { %1814 = vmatprep.subr.bf16.mxu1 %v2046_v60 }
  0xc3   : > { %671 = vst [vmem:[#allocation2 + $0x8] sm:$0xf] %v669_v29  ;;  %1815 = vmatpush3.bf16.msra.mxu1 %v2047_v61 }
  0xc4   : > { %1388 = vmatpush1.bf16.msra.mxu0 %v2001_v10  ;;  %1816 = vmatprep.subr.bf16.mxu1 %v2048_v62  ;;  %v2059_v10 = vld [vmem:[%s2457_s3 + $0x8] sm:$0xff]  }
  0xc5   : > { %1389 = vmatprep.subr.bf16.mxu0 %v2006_v12  ;;  %v2060_v12 = vld [vmem:[%s2457_s3 + $0x40] sm:$0xff]  }
  0xc7   : > { %1817 = vmatpush3.bf16.msra.mxu1 %v2049_v63 }
  0xc8   : > { %1390 = vmatpush1.bf16.msra.mxu0 %v2004_v21  ;;  %1818 = vmatprep.subr.bf16.mxu1 %v2050_v0 }
  0xc9   : > { %1391 = vmatprep.subr.bf16.mxu0 %v2009_v53  ;;  %v815_v53 = vsub.s32 0, %v2299_v41  ;;  %v1793_v41 = vld [vmem:[%s2458_s4] ss:$0 sm:$0xff] }
  0xca   : > { %v673_v35 = vld [vmem:[#allocation2 + $0x8] sm:$0xf] }
  0xcb   : > { %v675_v37 = vmul.f32 0.05, %v673_v35  ;;  %1819 = vmatpush3.bf16.msra.mxu1 %v2051_v1 }
  0xcc   : > { %1392 = vmatpush1.bf16.msra.mxu0 %v2007_v24  ;;  %1820 = vmatprep.subr.bf16.mxu1 %v2052_v2  ;;  %v816_v24 = vrot.slane %v811_v7, %v815_v53 }
  0xcd   : > { %1393 = vmatprep.subr.bf16.mxu0 %v2012_v27  ;;  %v701_v38 = vrot.slane %v675_v37, %v2335_v11  ;;  %v2031_v11 = vld [vmem:[#allocation4 + $0x2c0] ss:$8 sps:$4 sm:$0xff]  }
  0xcf   : > { %v702_v42 = vcombine.high %v701_v38, %v701_v38  ;;  %v713_v59 = vpack.c.bf16 %v701_v38, %v701_v38  ;;  %1821 = vmatpush3.bf16.msra.mxu1 %v2053_v3 }
  0xd0   : > { %1394 = vmatpush1.bf16.msra.mxu0 %v2010_v22  ;;  %1822 = vmatprep.subr.bf16.mxu1 %v2054_v4 }
  0xd1   : > { %1395 = vmatprep.subr.bf16.mxu0 %v2015_v31  ;;  %v714_v43 = vpack.c.bf16 %v702_v42, %v702_v42 }
  0xd3   : > { %1417 = vmatprep.mubr.bf16.mxu0 %v714_v43  ;;  %1823 = vmatpush3.bf16.msra.mxu1 %v2055_v5 }
  0xd4   : > { %1396 = vmatpush1.bf16.msra.mxu0 %v2013_v32  ;;  %1824 = vmatprep.subr.bf16.mxu1 %v2056_v6 }
  0xd5   : > { %1397 = vmatprep.subr.bf16.mxu0 %v2018_v33 }
  0xd7   : > { %1825 = vmatpush3.bf16.msra.mxu1 %v2057_v8 }
  0xd8   : > { %1398 = vmatpush1.bf16.msra.mxu0 %v2016_v34  ;;  %1826 = vmatprep.subr.bf16.mxu1 %v2058_v9 }
  0xd9   : > { %1399 = vmatprep.subr.bf16.mxu0 %v2021_v36 }
  0xdb   : > { %1827 = vmatpush3.bf16.msra.mxu1 %v2059_v10 }
  0xdc   : > { %1400 = vmatpush1.bf16.msra.mxu0 %v2019_v39  ;;  %1828 = vmatprep.subr.bf16.mxu1 %v2060_v12 }
  0xdd   : > { %1401 = vmatprep.subr.bf16.mxu0 %v2024_v40 }
  0xdf   : > { %1829 = vmatpush3.bf16.msra.mxu1 %v2061_v13 }
  0xe0   : > { %1402 = vmatpush2.bf16.msra.mxu0 %v2022_v44 }
  0xe1   : > { %1403 = vmatprep.subr.bf16.mxu0 %v2027_v45 }
  0xe4   : > { %1404 = vmatpush2.bf16.msra.mxu0 %v2025_v46 }
  0xe5   : > { %1405 = vmatprep.subr.bf16.mxu0 %v2030_v48 }
  0xe8   : > { %1406 = vmatpush2.bf16.msra.mxu0 %v2028_v49 }
  0xe9   : > { %1407 = vmatprep.subr.bf16.mxu0 %v2033_v50 }
  0xec   : > { %1408 = vmatpush2.bf16.msra.mxu0 %v2031_v11 }
  0xed   : > { %1409 = vmatprep.subr.bf16.mxu0 %v2036_v51 }
  0xf0   : > { %1410 = vmatpush2.bf16.msra.mxu0 %v2034_v52 }
  0xf1   : > { %1411 = vmatprep.subr.bf16.mxu0 %v2039_v54 }
  0xf4   : > { %1412 = vmatpush2.bf16.msra.mxu0 %v2037_v55 }
  0xf5   : > { %1413 = vmatprep.subr.bf16.mxu0 %v2042_v56 }
  0xf8   : > { %1414 = vmatpush2.bf16.msra.mxu0 %v2040_v57 }
  0xf9   : > { %1415 = vmatprep.subr.bf16.mxu0 %v2045_v47 }
  0xfc   : > { %1416 = vmatpush2.bf16.msra.mxu0 %v2043_v58 }
  0xff   : > { %1418 = vmatmul.mubr.bf16.vlgmr.msra.gmra.mxu0 %v713_v59 }
 0x17f   : > { %v1337_v14 = vpop.f32.mrf.mxu0 }
 0x180   : > { %v1338_v26 = vadd.f32 %v1337_v14, %v816_v24 }
 0x181   : > { %v1339_v15 = vpop.f32.mrf.mxu0  ;;  %v1378_v16 = vpop.f32.mrf.mxu1 }
 0x182   : > { %v1340_v27 = vadd.f32 %v1339_v15, %v820_v25  ;;  %v1379_v28 = vadd.f32 %v1378_v16, %v1338_v26 }
 0x183   : > { %v1341_v17 = vpop.f32.mrf.mxu0  ;;  %v1380_v18 = vpop.f32.mrf.mxu1 }
 0x184   : > { %v1381_v29 = vadd.f32 %v1380_v18, %v1340_v27 }
 0x185   : > { %v1342_v19 = vpop.f32.mrf.mxu0  ;;  %v1382_v20 = vpop.f32.mrf.mxu1 }
 0x187   : > { %v1383_v21 = vpop.f32.mrf.mxu1 }
 0x1bf   : > { %v1419_v30 = vpop.f32.mrf.mxu0 }
 0x1c0   : > { %v1420_v22 = vadd.f32 %v1419_v30, %v1379_v28 }
 0x1c1   : > { %v1421_v31 = vpop.f32.mrf.mxu0 }
 0x1c2   : > { %v1422_v32 = vadd.f32 %v1421_v31, %v1381_v29  ;;  %v1426_v33 = vmax.f32 %v1420_v22, 0.0 }
 0x1c3   : > { %v1423_v34 = vpop.f32.mrf.mxu0 }
 0x1c4   : > { %v1427_v35 = vmax.f32 %v1422_v32, 0.0  ;;  %v1428_v38 = vpack.c.bf16 %v1426_v33, %v1426_v33 }
 0x1c5   : > { %v1424_v36 = vpop.f32.mrf.mxu0 }
 0x1c6   : > { %v1429_v37 = vpack.c.bf16 %v1427_v35, %v1427_v35 }
 0x1c8   : > { %1597 = vmatprep.mubr.bf16.mxu1 %v1429_v37 }
 0x1c9   : > { %1598 = vmatmul.mubr.bf16.vlgmr.msra.gmra.mxu1 %v1428_v38 }
 0x289   : > { %v1830_v39 = vpop.f32.mrf.mxu1 }
 0x28b   : > { %v1831_v40 = vpop.f32.mrf.mxu1 }
 0x28c   : > { %v1832_v42 = vadd.f32 %v1831_v40, %v1830_v39 }
 0x28d   : > { %v1833_v43 = vpop.f32.mrf.mxu1 }
 0x28e   : > { %v1600_v44 = vadd.f32 %v1832_v42, %v1793_v41 }
 0x28f   : > { %v1834_v45 = vpop.f32.mrf.mxu1 }
 0x290   : > { %1605 = vst [vmem:[#allocation7] sm:$0x3] %v1600_v44 }
 0x291 PF: > { %p2424_p9 = scmp.eq.s32.totalorder %s1686_s23, 2  ;;  %s2166_s18 = smov [#allocation7]  }
 0x292   : > { %s1615_s20 = sshll.u32 %s2166_s18, 4  ;;  %s1616_s20 = int_to_ptr.vmem [resolvable:$true] %s1615_s20 }
 0x293   : > { %s2088_s28 = scalar_lea.vmem %s1616_s20, 32  ;;  %p2095_p13 = scmp.lt.s32.totalorder %s1616_s20, %s1616_s20 }
 0x294   : > { %p2089_p10 = scmp.ne.s32.totalorder %s1616_s20, %s2088_s28  ;;  %p2096_p0 = scmp.lt.s32.totalorder %s2088_s28, %s2088_s28 }
 0x296   : > { %p2090_p11 = pnand %p2089_p10, %p2424_p9  ;;  %p2097_p1 = por %p2096_p0, %p2095_p13 }
 0x298   : > { %p2091_p12 = pneg %p2090_p11 }
 0x29a   : > { %p2098_p2 = pnand %p2097_p1, %p2091_p12 }
 0x29c   : > { %2101 = shalt.err (!%p2098_p2)
}
 0x29d   : > { %1844 = dma.vmem_to_hbm [thread:$0]  (%p2424_p9), %s1616_s20, 32, %s2459_s5, [#allocation6]  }
 0x29e   : > { %2137 = dma.done.wait (%p2424_p9), [#allocation6], 32  }
 0x29f   : > { %2139 = vsyncadd (%p2424_p9), [#allocation6], 4294967264 }
 0x2a0 PF: > { %s17_s22 = sadd.s32 1, %s2158_s22   ;;  %s2464_s18 = smov %s2146_s19 }
 0x2a1   : > { %p14_p4 = scmp.ge.s32.totalorder %s17_s22, 5   ;;  %s2465_s19 = smov %s2249_s30 }
 0x2a2   : > { %s2466_s20 = smov %s2154_s21  ;;  %s2467_s21 = smov %s2469_s24 }
 0x2a3   :  { %16 = sbr.rel (!%p14_p4) target bundleno = 4 (0x4), region = 113 }
 0x2a8   :  { %1628 = vsyncpa [#allocation5], 1 }
 0x2a9   :  { %1630 = vsyncpa [#allocation5 + $0x1], 1 }
 0x2aa   :  { %1631 = vsyncpa [#allocation6], 1 }
 0x2ab   :  { %1633 = vsyncpa [#allocation6 + $0x1], 1 }

</bundles_post_ra>
